<compile_context>
chip_gen: v7x
topology: tpu7x:2x2x1
jax: 0.10.0
libtpu: 0.0.40
codegen_flags: <defaults>
</compile_context>

<pallas_src>
import jax
import jax.numpy as jnp
from jax.experimental import pallas as pl
from jax.experimental.pallas import tpu as pltpu


# ---------------------------------------------------------------------------
# Kernels
# ---------------------------------------------------------------------------

def _dense_tanh_kernel(h_ref, t_ref, wh_ref, wt_ref, b_ref, x_ref):
    """x = tanh(heads @ Wh + tails @ Wt + b), computed once per row tile."""
    acc = jnp.dot(h_ref[...], wh_ref[...], preferred_element_type=jnp.float32)
    acc = acc + jnp.dot(t_ref[...], wt_ref[...],
                        preferred_element_type=jnp.float32)
    acc = acc + b_ref[...]                      # f32 bias row, broadcasts
    # dropout = identity at inference (pooler_dropout only active in training).
    x_ref[...] = jnp.tanh(acc).astype(x_ref.dtype)


def _score_kernel(x_ref, relT_ref, out_ref):
    """scores tile = x_tile @ rel_nT_tile   ([tm, inner] x [inner, tn])."""
    out_ref[...] = jnp.dot(x_ref[...], relT_ref[...],
                           preferred_element_type=jnp.float32)


# ---------------------------------------------------------------------------
# Tiling / VMEM budgeting helpers
# ---------------------------------------------------------------------------

def _round_up(n, m):
    return (n + m - 1) // m * m


def _vmem_budget_bytes():
    """Usable VMEM budget for tile selection; queries the chip when possible."""
    try:
        cap = int(pltpu.get_tpu_info().vmem_capacity_bytes)
    except Exception:
        cap = 64 * 1024 * 1024          # conservative fallback: v7x per-TC VMEM
    # Leave headroom for Mosaic internal scratch / metadata.
    return min(int(0.80 * cap), cap - 8 * 1024 * 1024)


def _stage1_vmem(tm, input_dim, inner, in_isz, x_isz):
    stream = 2 * (2 * tm * input_dim * in_isz)                    # heads+tails tiles (dbl-buf)
    resident = 2 * (2 * input_dim * inner * in_isz + inner * 4)   # weight halves + bias (2 bufs)
    out = 2 * tm * inner * x_isz                                  # x tile (dbl-buf)
    interm = tm * inner * 4                                       # f32 accumulator / tanh
    return int(1.2 * (stream + resident + out + interm)) + (2 << 20)


def _stage2_vmem(tm, tn, inner, isz):
    stream = 2 * (tm * inner * isz + inner * tn * isz)            # x / rel_nT tiles (dbl-buf)
    out = 2 * tm * tn * 4                                         # f32 output tile (dbl-buf)
    interm = tm * tn * 4                                          # MXU result before store
    return int(1.2 * (stream + out + interm)) + (2 << 20)


def _tile_candidates(Bp):
    cands = [c for c in (2048, 1024, 512, 256, 128) if c <= Bp and Bp % c == 0]
    return cands or [Bp]


def _pick_stage1_tile(Bp, input_dim, inner, in_isz, x_isz, budget):
    cands = _tile_candidates(Bp)
    for tm in cands:                                  # largest first
        est = _stage1_vmem(tm, input_dim, inner, in_isz, x_isz)
        if est <= budget:
            return tm, est
    tm = cands[-1]
    return tm, _stage1_vmem(tm, input_dim, inner, in_isz, x_isz)


def _pick_stage2_tiles(Bp, inner, isz, budget):
    cands = _tile_candidates(Bp)
    best = None
    for tn in cands:                                  # keep tn (lane dim) as wide as possible
        for tm in cands:                              # shrink tm before shrinking tn
            est = _stage2_vmem(tm, tn, inner, isz)
            if est <= budget:
                key = (tm * tn, tn)
                if best is None or key > best[0]:
                    best = (key, tm, tn, est)
    if best is None:
        tm = tn = cands[-1]
        return tm, tn, _stage2_vmem(tm, tn, inner, isz)
    return best[1], best[2], best[3]


# ---------------------------------------------------------------------------
# Parameter prep + forward wrapper
# ---------------------------------------------------------------------------

def prepare_head_params(dense_w, dense_b, *, mxu_dtype=jnp.float32):
    """One-time parameter re-layout, kept off the forward critical path.
    PyTorch dense.weight is [inner, 2*input_dim]; the kernels want the two
    transposed halves [input_dim, inner] (heads half, tails half), cast once
    to the MXU input dtype, plus a [1, inner] f32 bias row."""
    w = jnp.asarray(dense_w)
    inner, K = w.shape
    input_dim = K // 2
    wT = w.T.astype(jnp.dtype(mxu_dtype))                         # [2*input_dim, inner]
    return (wT[:input_dim], wT[input_dim:],
            jnp.asarray(dense_b, jnp.float32).reshape(1, -1))


def binary_class_mlp_head(heads, tails, rel_ids, emb_weight,
                          wT_heads, wT_tails, bias_row, *,
                          mxu_dtype=jnp.float32):
    """heads/tails: [B, input_dim] f32; rel_ids: [B] int32;
    emb_weight: [num_classes, inner] f32; wT_heads/wT_tails: [input_dim, inner]
    (from prepare_head_params); bias_row: [1, inner] f32.
    Returns scores [B, B, 1] f32."""
    B, input_dim = heads.shape
    inner = wT_heads.shape[1]
    in_dtype = jnp.dtype(mxu_dtype)
    in_isz = in_dtype.itemsize

    # Tiny glue left to XLA: embedding gather + F.normalize + transpose
    # (B*inner elements, negligible next to the [B, B] output).
    rel = emb_weight[rel_ids].astype(jnp.float32)                 # [B, inner]
    sq = jnp.sum(rel * rel, axis=-1, keepdims=True)
    # sqrt(max(sq, 1e-24)) == max(||rel||, 1e-12)  => matches F.normalize eps.
    rel_n = rel * jax.lax.rsqrt(jnp.maximum(sq, 1e-24))

    # Pad the batch to a lane-dense multiple of 128 (unmasked stores on the
    # [B, B] output); padded rows are zero and get sliced off below.
    Bp = max(_round_up(B, 128), 128)
    pad = Bp - B
    if pad:
        heads = jnp.pad(heads, ((0, pad), (0, 0)))
        tails = jnp.pad(tails, ((0, pad), (0, 0)))
        rel_n = jnp.pad(rel_n, ((0, pad), (0, 0)))
    heads = heads.astype(in_dtype)
    tails = tails.astype(in_dtype)
    rel_nT = rel_n.T.astype(in_dtype)                             # [inner, Bp]  ([K, N] for MXU)

    budget = _vmem_budget_bytes()

    # ---- stage 1: x = tanh(heads @ Wh + tails @ Wt + b), once per row tile ----
    tm1, est1 = _pick_stage1_tile(Bp, input_dim, inner, in_isz, in_isz, budget)
    x = pl.pallas_call(
        _dense_tanh_kernel,
        out_shape=jax.ShapeDtypeStruct((Bp, inner), in_dtype),
        grid_spec=pltpu.PrefetchScalarGridSpec(
            num_scalar_prefetch=0,
            grid=(Bp // tm1,),
            in_specs=[
                pl.BlockSpec((tm1, input_dim), lambda i: (i, 0)),   # heads rows
                pl.BlockSpec((tm1, input_dim), lambda i: (i, 0)),   # tails rows
                pl.BlockSpec((input_dim, inner), lambda i: (0, 0)),  # W (heads half, resident)
                pl.BlockSpec((input_dim, inner), lambda i: (0, 0)),  # W (tails half, resident)
                pl.BlockSpec((1, inner), lambda i: (0, 0)),          # bias row (resident)
            ],
            out_specs=pl.BlockSpec((tm1, inner), lambda i: (i, 0)),
        ),
        compiler_params=pltpu.CompilerParams(
            dimension_semantics=("parallel",),
            vmem_limit_bytes=max(4 << 20, est1)),
        cost_estimate=pl.CostEstimate(
            flops=2 * Bp * 2 * input_dim * inner,
            transcendentals=Bp * inner,
            bytes_accessed=(2 * Bp * input_dim + 2 * input_dim * inner) * in_isz
                           + inner * 4 + Bp * inner * in_isz),
    )(heads, tails, wT_heads, wT_tails, bias_row)

    # ---- stage 2: scores = x @ rel_nT  ([Bp, Bp] f32, lane-dense tiles) ----
    tm2, tn2, est2 = _pick_stage2_tiles(Bp, inner, in_isz, budget)
    out = pl.pallas_call(
        _score_kernel,
        out_shape=jax.ShapeDtypeStruct((Bp, Bp), jnp.float32),
        grid_spec=pltpu.PrefetchScalarGridSpec(
            num_scalar_prefetch=0,
            grid=(Bp // tm2, Bp // tn2),
            in_specs=[
                pl.BlockSpec((tm2, inner), lambda i, j: (i, 0)),     # x row tile
                pl.BlockSpec((inner, tn2), lambda i, j: (0, j)),     # rel_nT column tile
            ],
            out_specs=pl.BlockSpec((tm2, tn2), lambda i, j: (i, j)),
        ),
        compiler_params=pltpu.CompilerParams(
            dimension_semantics=("parallel", "parallel"),
            vmem_limit_bytes=max(4 << 20, est2)),
        cost_estimate=pl.CostEstimate(
            flops=2 * Bp * Bp * inner,
            transcendentals=0,
            bytes_accessed=2 * Bp * inner * in_isz + Bp * Bp * 4),
    )(x, rel_nT)

    # scores[k, i, 0] = dot(x[k], rel_n[i]); drop padding, match torch's [B, B, 1].
    return out[:B, :B].reshape(B, B, 1)


# ---------------------------------------------------------------------------
# Reference + test
# ---------------------------------------------------------------------------

def _reference(heads, tails, rel_ids, emb_weight, dense_w, dense_b):
    rel = emb_weight[rel_ids]
    rel = rel / jnp.maximum(jnp.linalg.norm(rel, axis=-1, keepdims=True), 1e-12)
    x = jnp.concatenate([heads, tails], axis=-1) @ dense_w.T + dense_b
    x = jnp.tanh(x)
    return (x @ rel.T)[..., None]                                  # [B, B, 1]


if __name__ == "__main__":
    B, input_dim, inner_dim, num_classes = 8, 16, 32, 4

    key = jax.random.PRNGKey(0)
    k1, k2, k3, k4, k5, k6 = jax.random.split(key, 6)

    heads = jax.random.normal(k1, (B, input_dim), dtype=jnp.float32)
    tails = jax.random.normal(k2, (B, input_dim), dtype=jnp.float32)
    rel_ids = jax.random.randint(k3, (B,), 0, num_classes, dtype=jnp.int32)

    # nn.Embedding weight with xavier_uniform_: U(-a, a), a = sqrt(6/(fan_in+fan_out))
    a_emb = (6.0 / (num_classes + inner_dim)) ** 0.5
    emb_weight = jax.random.uniform(k4, (num_classes, inner_dim),
                                    minval=-a_emb, maxval=a_emb, dtype=jnp.float32)
    # nn.Linear(input_dim*2, inner_dim): weight [inner, 2*input_dim], bias [inner]
    bound = 1.0 / (2 * input_dim) ** 0.5
    dense_w = jax.random.uniform(k5, (inner_dim, 2 * input_dim),
                                 minval=-bound, maxval=bound, dtype=jnp.float32)
    dense_b = jax.random.uniform(k6, (inner_dim,),
                                 minval=-bound, maxval=bound, dtype=jnp.float32)

    # One-time parameter re-layout (off the forward critical path).
    wT_heads, wT_tails, bias_row = prepare_head_params(dense_w, dense_b)

    scores = binary_class_mlp_head(heads, tails, rel_ids, emb_weight,
                                   wT_heads, wT_tails, bias_row)
    scores = jax.block_until_ready(scores)

    ref = _reference(heads, tails, rel_ids, emb_weight, dense_w, dense_b)
    assert scores.shape == (B, B, 1), scores.shape
    assert jnp.allclose(scores, ref, atol=1e-5, rtol=1e-5), "mismatch vs reference"

    print("KERNEL_OK")
</pallas_src>

<mosaic_0001>
module attributes {stable_mosaic.version = 11 : i64} {
  func.func @_dense_tanh_kernel(%arg0: i32, %arg1: memref<128x16xf32, #tpu.memory_space<vmem>>, %arg2: memref<128x16xf32, #tpu.memory_space<vmem>>, %arg3: memref<16x32xf32, #tpu.memory_space<vmem>>, %arg4: memref<16x32xf32, #tpu.memory_space<vmem>>, %arg5: memref<1x32xf32, #tpu.memory_space<vmem>>, %arg6: memref<128x32xf32, #tpu.memory_space<vmem>>) attributes {dimension_semantics = [#tpu.dimension_semantics<parallel>], iteration_bounds = array<i64: 1>, scalar_prefetch = 0 : i64, scratch_operands = 0 : i64, tpu.core_type = #tpu.core_type<tc>, window_params = [{transform_indices = @transform_0, window_bounds = array<i64: 128, 16>}, {transform_indices = @transform_1, window_bounds = array<i64: 128, 16>}, {pipeline_mode = #tpu.pipeline_mode<synchronous>, transform_indices = @transform_2, window_bounds = array<i64: 16, 32>}, {pipeline_mode = #tpu.pipeline_mode<synchronous>, transform_indices = @transform_3, window_bounds = array<i64: 16, 32>}, {pipeline_mode = #tpu.pipeline_mode<synchronous>, transform_indices = @transform_4, window_bounds = array<i64: 1, 32>}, {transform_indices = @transform_5, window_bounds = array<i64: 128, 32>}]} {
    %c0 = arith.constant 0 : index
    %c0_0 = arith.constant 0 : index
    %0 = vector.load %arg1[%c0, %c0_0] : memref<128x16xf32, #tpu.memory_space<vmem>>, vector<128x16xf32>
    %c0_1 = arith.constant 0 : index
    %c0_2 = arith.constant 0 : index
    %1 = vector.load %arg3[%c0_1, %c0_2] : memref<16x32xf32, #tpu.memory_space<vmem>>, vector<16x32xf32>
    %cst = arith.constant dense<0.000000e+00> : vector<128x32xf32>
    %2 = tpu.matmul %0, %1, %cst {dimension_numbers = #tpu.dot_dimension_numbers<[1], [0], [0], [1], [0, 0, 1, 1], [], []>} : vector<128x16xf32>, vector<16x32xf32>, vector<128x32xf32> -> vector<128x32xf32>
    %c0_3 = arith.constant 0 : index
    %c0_4 = arith.constant 0 : index
    %3 = vector.load %arg2[%c0_3, %c0_4] : memref<128x16xf32, #tpu.memory_space<vmem>>, vector<128x16xf32>
    %c0_5 = arith.constant 0 : index
    %c0_6 = arith.constant 0 : index
    %4 = vector.load %arg4[%c0_5, %c0_6] : memref<16x32xf32, #tpu.memory_space<vmem>>, vector<16x32xf32>
    %cst_7 = arith.constant dense<0.000000e+00> : vector<128x32xf32>
    %5 = tpu.matmul %3, %4, %cst_7 {dimension_numbers = #tpu.dot_dimension_numbers<[1], [0], [0], [1], [0, 0, 1, 1], [], []>} : vector<128x16xf32>, vector<16x32xf32>, vector<128x32xf32> -> vector<128x32xf32>
    %6 = arith.addf %2, %5 : vector<128x32xf32>
    %c0_8 = arith.constant 0 : index
    %c0_9 = arith.constant 0 : index
    %7 = vector.load %arg5[%c0_8, %c0_9] : memref<1x32xf32, #tpu.memory_space<vmem>>, vector<1x32xf32>
    %8 = vector.broadcast %7 : vector<1x32xf32> to vector<128x32xf32>
    %9 = arith.addf %6, %8 : vector<128x32xf32>
    %10 = math.tanh %9 : vector<128x32xf32>
    %c0_10 = arith.constant 0 : index
    %c0_11 = arith.constant 0 : index
    %11 = vector.load %arg6[%c0_10, %c0_11] : memref<128x32xf32, #tpu.memory_space<vmem>>, vector<128x32xf32>
    tpu.vector_store %arg6[%c0_10, %c0_11], %10 {strides = array<i32>} : memref<128x32xf32, #tpu.memory_space<vmem>>, vector<128x32xf32>,
    return
  }
  func.func @transform_0(%arg0: i32) -> (i32, i32) {
    %c0_i32 = arith.constant 0 : i32
    %c0_i32_0 = arith.constant 0 : i32
    return %arg0, %c0_i32 : i32, i32
  }
  func.func @transform_1(%arg0: i32) -> (i32, i32) {
    %c0_i32 = arith.constant 0 : i32
    %c0_i32_0 = arith.constant 0 : i32
    return %arg0, %c0_i32 : i32, i32
  }
  func.func @transform_2(%arg0: i32) -> (i32, i32) {
    %c0_i32 = arith.constant 0 : i32
    %c0_i32_0 = arith.constant 0 : i32
    %c0_i32_1 = arith.constant 0 : i32
    return %c0_i32, %c0_i32_0 : i32, i32
  }
  func.func @transform_3(%arg0: i32) -> (i32, i32) {
    %c0_i32 = arith.constant 0 : i32
    %c0_i32_0 = arith.constant 0 : i32
    %c0_i32_1 = arith.constant 0 : i32
    return %c0_i32, %c0_i32_0 : i32, i32
  }
  func.func @transform_4(%arg0: i32) -> (i32, i32) {
    %c0_i32 = arith.constant 0 : i32
    %c0_i32_0 = arith.constant 0 : i32
    %c0_i32_1 = arith.constant 0 : i32
    return %c0_i32, %c0_i32_0 : i32, i32
  }
  func.func @transform_5(%arg0: i32) -> (i32, i32) {
    %c0_i32 = arith.constant 0 : i32
    %c0_i32_0 = arith.constant 0 : i32
    return %arg0, %c0_i32 : i32, i32
  }
}

</mosaic_0001>

<bundles_post_ra>
// kernel: tpu_custom_call.1
= control target key start
LH: loop header
LB: loop body
LE: loop exit
PB: predicated region body
PF: predicated region fallthrough
CT: control target
= control target key end

     0   :  { %vm56_vm0 = vcmask 130048   ;;  %vm482_vm1 = vcmask 261120   ;;  %s939_s3 = inlined_call_operand.vmem [shape: f32[16,32], index: 3, kind: input, shape index: {}]   ;;  %s940_s2 = inlined_call_operand.vmem [shape: f32[16,32], index: 2, kind: input, shape index: {}]   ;;  %s941_s1 = inlined_call_operand.vmem [shape: f32[128,16], index: 1, kind: input, shape index: {}]   ;;  %s942_s0 = inlined_call_operand.vmem [shape: f32[128,16], index: 0, kind: input, shape index: {}]   ;;  %s943_s4 = inlined_call_operand.vmem [shape: f32[1,32], index: 4, kind: input, shape index: {}]   ;;  %s944_s5 = inlined_call_operand.vmem [shape: f32[128,32], index: 5, kind: output, shape index: {}]  }
   0x1   :  { %v54_v0 = vld [vmem:[%s939_s3] sm:$0xff]  ;;  %v55_v1 = vld [vmem:[%s939_s3 + $0x8] sm:$0xff]  ;;  %v40_v10 = vld [vmem:[%s941_s1 + $0x10] sm:$0xff] }
   0x2   :  { %v36_v2 = vld [vmem:[%s940_s2] sm:$0xff]  ;;  %v628_v3 = vpack.c.bf16 %v55_v1, %v54_v0  ;;  %v37_v4 = vld [vmem:[%s940_s2 + $0x8] sm:$0xff]  ;;  %v22_v11 = vld [vmem:[%s942_s0 + $0x10] sm:$0xff] }
   0x3   :  { %v38_v5 = vld [vmem:[%s941_s1] sm:$0xff]  ;;  %v632_v7 = vpack.c.bf16 %v37_v4, %v36_v2  ;;  %v39_v8 = vld [vmem:[%s941_s1 + $0x8] sm:$0xff]  ;;  %v41_v12 = vld [vmem:[%s941_s1 + $0x18] sm:$0xff] }
   0x4   :  { %v20_v6 = vld [vmem:[%s942_s0] sm:$0xff]  ;;  %576 = vmatprep.mubr.msk.f32.mxu1 %vm56_vm0, %v38_v5  ;;  %629 = vmatprep.subr.bf16.mxu1 %v628_v3  ;;  %v21_v9 = vld [vmem:[%s942_s0 + $0x8] sm:$0xff]  ;;  %v23_v13 = vld [vmem:[%s942_s0 + $0x18] sm:$0xff] }
   0x5   :  { %604 = vmatprep.mubr.msk.f32.mxu0 %vm56_vm0, %v20_v6  ;;  %633 = vmatprep.subr.bf16.mxu0 %v632_v7  ;;  %v42_v14 = vld [vmem:[%s941_s1 + $0x20] sm:$0xff]  ;;  %v43_v16 = vld [vmem:[%s941_s1 + $0x28] sm:$0xff]  ;;  %v44_v18 = vld [vmem:[%s941_s1 + $0x30] sm:$0xff] }
   0x6   :  { %631 = vmatpush3.bf16.msra.mxu1 %v628_v3  ;;  %635 = vmatpush3.bf16.msra.mxu0 %v632_v7  ;;  %v24_v15 = vld [vmem:[%s942_s0 + $0x20] sm:$0xff]  ;;  %v25_v17 = vld [vmem:[%s942_s0 + $0x28] sm:$0xff]  ;;  %v26_v19 = vld [vmem:[%s942_s0 + $0x30] sm:$0xff] }
   0x7   :  { %v45_v20 = vld [vmem:[%s941_s1 + $0x38] sm:$0xff]  ;;  %v46_v22 = vld [vmem:[%s941_s1 + $0x40] sm:$0xff]  ;;  %v47_v24 = vld [vmem:[%s941_s1 + $0x48] sm:$0xff] }
   0x8   :  { %v27_v21 = vld [vmem:[%s942_s0 + $0x38] sm:$0xff]  ;;  %v28_v23 = vld [vmem:[%s942_s0 + $0x40] sm:$0xff]  ;;  %v29_v25 = vld [vmem:[%s942_s0 + $0x48] sm:$0xff] }
   0x9   :  { %577 = vmatmul.mubr.msk.f32.vlgmr.msra.gmra.mrb[0].mxu1 %vm56_vm0, %v39_v8  ;;  %605 = vmatmul.mubr.msk.f32.vlgmr.msra.gmra.mrb[0].mxu0 %vm56_vm0, %v21_v9  ;;  %v48_v26 = vld [vmem:[%s941_s1 + $0x50] sm:$0xff]  ;;  %v49_v28 = vld [vmem:[%s941_s1 + $0x58] sm:$0xff]  ;;  %v50_v30 = vld [vmem:[%s941_s1 + $0x60] sm:$0xff] }
   0xa   :  { %579 = vmatprep.mubr.msk.f32.mxu1 %vm56_vm0, %v40_v10  ;;  %607 = vmatprep.mubr.msk.f32.mxu0 %vm56_vm0, %v22_v11  ;;  %v30_v27 = vld [vmem:[%s942_s0 + $0x50] sm:$0xff]  ;;  %v31_v29 = vld [vmem:[%s942_s0 + $0x58] sm:$0xff]  ;;  %v32_v31 = vld [vmem:[%s942_s0 + $0x60] sm:$0xff] }
   0xb   :  { %v51_v32 = vld [vmem:[%s941_s1 + $0x68] sm:$0xff]  ;;  %v52_v34 = vld [vmem:[%s941_s1 + $0x70] sm:$0xff]  ;;  %v53_v36 = vld [vmem:[%s941_s1 + $0x78] sm:$0xff] }
   0xc   :  { %v33_v33 = vld [vmem:[%s942_s0 + $0x68] sm:$0xff]  ;;  %v34_v35 = vld [vmem:[%s942_s0 + $0x70] sm:$0xff]  ;;  %v35_v37 = vld [vmem:[%s942_s0 + $0x78] sm:$0xff] }
   0xd   :  { %580 = vmatmul.mubr.msk.f32.gmra.mrb[2].mxu1 %vm56_vm0, %v41_v12  ;;  %608 = vmatmul.mubr.msk.f32.gmra.mrb[2].mxu0 %vm56_vm0, %v23_v13  ;;  %v857_v40 = vld [vmem:[%s943_s4] ss:$0 sm:$0xff] }
   0xe   :  { %582 = vmatprep.mubr.msk.f32.mxu1 %vm56_vm0, %v42_v14  ;;  %610 = vmatprep.mubr.msk.f32.mxu0 %vm56_vm0, %v24_v15 }
  0x11   :  { %583 = vmatmul.mubr.msk.f32.gmra.mrb[4].mxu1 %vm56_vm0, %v43_v16  ;;  %611 = vmatmul.mubr.msk.f32.gmra.mrb[4].mxu0 %vm56_vm0, %v25_v17 }
  0x12   :  { %585 = vmatprep.mubr.msk.f32.mxu1 %vm56_vm0, %v44_v18  ;;  %613 = vmatprep.mubr.msk.f32.mxu0 %vm56_vm0, %v26_v19 }
  0x15   :  { %586 = vmatmul.mubr.msk.f32.gmra.mrb[6].mxu1 %vm56_vm0, %v45_v20  ;;  %614 = vmatmul.mubr.msk.f32.gmra.mrb[6].mxu0 %vm56_vm0, %v27_v21 }
  0x16   :  { %588 = vmatprep.mubr.msk.f32.mxu1 %vm56_vm0, %v46_v22  ;;  %616 = vmatprep.mubr.msk.f32.mxu0 %vm56_vm0, %v28_v23 }
  0x19   :  { %589 = vmatmul.mubr.msk.f32.gmra.mrb[8].mxu1 %vm56_vm0, %v47_v24  ;;  %617 = vmatmul.mubr.msk.f32.gmra.mrb[8].mxu0 %vm56_vm0, %v29_v25 }
  0x1a   :  { %591 = vmatprep.mubr.msk.f32.mxu1 %vm56_vm0, %v48_v26  ;;  %619 = vmatprep.mubr.msk.f32.mxu0 %vm56_vm0, %v30_v27 }
  0x1d   :  { %592 = vmatmul.mubr.msk.f32.gmra.mrb[10].mxu1 %vm56_vm0, %v49_v28  ;;  %620 = vmatmul.mubr.msk.f32.gmra.mrb[10].mxu0 %vm56_vm0, %v31_v29 }
  0x1e   :  { %594 = vmatprep.mubr.msk.f32.mxu1 %vm56_vm0, %v50_v30  ;;  %622 = vmatprep.mubr.msk.f32.mxu0 %vm56_vm0, %v32_v31 }
  0x21   :  { %595 = vmatmul.mubr.msk.f32.gmra.mrb[12].mxu1 %vm56_vm0, %v51_v32  ;;  %623 = vmatmul.mubr.msk.f32.gmra.mrb[12].mxu0 %vm56_vm0, %v33_v33 }
  0x22   :  { %597 = vmatprep.mubr.msk.f32.mxu1 %vm56_vm0, %v52_v34  ;;  %625 = vmatprep.mubr.msk.f32.mxu0 %vm56_vm0, %v34_v35 }
  0x25   :  { %598 = vmatmul.mubr.msk.f32.gmra.mrb[14].mxu1 %vm56_vm0, %v53_v36  ;;  %626 = vmatmul.mubr.msk.f32.gmra.mrb[14].mxu0 %vm56_vm0, %v35_v37 }
  0xdc   :  { %v578_v38 = vpop.f32.mrb[0].mxu1  ;;  %v606_v39 = vpop.f32.mrb[0].mxu0 }
  0xdd   :  { %v171_v41 = vpop.f32.mrb[1].mxu1  ;;  %v370_v42 = vadd.f32 %v606_v39, %v578_v38  ;;  %v364_v43 = vpop.f32.mrb[1].mxu0 }
  0xde   :  { %v365_v44 = vadd.f32 %v364_v43, %v171_v41 }
  0xdf   :  { %v451_v45 = vadd.f32 %v857_v40, %v370_v42 }
  0xe0   :  { %v581_v46 = vpop.f32.mrb[2].mxu1  ;;  %v450_v47 = vadd.f32 %v857_v40, %v365_v44  ;;  %v609_v48 = vpop.f32.mrb[2].mxu0 }
  0xe1   :  { %v181_v49 = vpop.f32.mrb[3].mxu1  ;;  %652 = vtanh.f32 %v451_v45  ;;  %v380_v50 = vadd.f32 %v609_v48, %v581_v46  ;;  %v374_v51 = vpop.f32.mrb[3].mxu0 }
  0xe2   :  { %654 = vtanh.f32 %v450_v47  ;;  %v375_v52 = vadd.f32 %v374_v51, %v181_v49 }
  0xe3   :  { %v453_v53 = vadd.f32 %v857_v40, %v380_v50 }
  0xe4   :  { %v584_v54 = vpop.f32.mrb[4].mxu1  ;;  %v452_v55 = vadd.f32 %v857_v40, %v375_v52  ;;  %v612_v56 = vpop.f32.mrb[4].mxu0 }
  0xe5   :  { %v191_v57 = vpop.f32.mrb[5].mxu1  ;;  %656 = vtanh.f32 %v453_v53  ;;  %v390_v58 = vadd.f32 %v612_v56, %v584_v54  ;;  %v384_v59 = vpop.f32.mrb[5].mxu0 }
  0xe6   :  { %658 = vtanh.f32 %v452_v55  ;;  %v385_v60 = vadd.f32 %v384_v59, %v191_v57 }
  0xe7   :  { %v455_v61 = vadd.f32 %v857_v40, %v390_v58 }
  0xe8   :  { %v587_v62 = vpop.f32.mrb[6].mxu1  ;;  %v454_v63 = vadd.f32 %v857_v40, %v385_v60  ;;  %v615_v0 = vpop.f32.mrb[6].mxu0 }
  0xe9   :  { %v201_v1 = vpop.f32.mrb[7].mxu1  ;;  %660 = vtanh.f32 %v455_v61  ;;  %v400_v2 = vadd.f32 %v615_v0, %v587_v62  ;;  %v394_v3 = vpop.f32.mrb[7].mxu0 }
  0xea   :  { %662 = vtanh.f32 %v454_v63  ;;  %v395_v4 = vadd.f32 %v394_v3, %v201_v1 }
  0xeb   :  { %v653_v5 = vpop.eup %652  ;;  %v457_v6 = vadd.f32 %v857_v40, %v400_v2 }
  0xec   :  { %v590_v7 = vpop.f32.mrb[8].mxu1  ;;  %v655_v8 = vpop.eup %654  ;;  %484 = vst.msk [vmem:[%s944_s5 + $0x8] sm:$0xff] %vm482_vm1, %v653_v5  ;;  %v456_v9 = vadd.f32 %v857_v40, %v395_v4 }
  0xed   :  { %v618_v10 = vpop.f32.mrb[8].mxu0  ;;  %v211_v11 = vpop.f32.mrb[9].mxu1  ;;  %483 = vst.msk [vmem:[%s944_s5] sm:$0xff] %vm482_vm1, %v655_v8  ;;  %664 = vtanh.f32 %v457_v6 }
  0xee   :  { %v410_v12 = vadd.f32 %v618_v10, %v590_v7  ;;  %v404_v13 = vpop.f32.mrb[9].mxu0  ;;  %666 = vtanh.f32 %v456_v9 }
  0xef   :  { %v405_v14 = vadd.f32 %v404_v13, %v211_v11  ;;  %v657_v15 = vpop.eup %656 }
  0xf0   :  { %v459_v16 = vadd.f32 %v857_v40, %v410_v12  ;;  %v593_v17 = vpop.f32.mrb[10].mxu1  ;;  %v659_v18 = vpop.eup %658  ;;  %486 = vst.msk [vmem:[%s944_s5 + $0x18] sm:$0xff] %vm482_vm1, %v657_v15 }
  0xf1   :  { %v458_v19 = vadd.f32 %v857_v40, %v405_v14  ;;  %v621_v20 = vpop.f32.mrb[10].mxu0  ;;  %v221_v21 = vpop.f32.mrb[11].mxu1  ;;  %485 = vst.msk [vmem:[%s944_s5 + $0x10] sm:$0xff] %vm482_vm1, %v659_v18 }
  0xf2   :  { %668 = vtanh.f32 %v459_v16  ;;  %v420_v22 = vadd.f32 %v621_v20, %v593_v17  ;;  %v414_v23 = vpop.f32.mrb[11].mxu0 }
  0xf3   :  { %670 = vtanh.f32 %v458_v19  ;;  %v415_v24 = vadd.f32 %v414_v23, %v221_v21  ;;  %v661_v25 = vpop.eup %660 }
  0xf4   :  { %v461_v26 = vadd.f32 %v857_v40, %v420_v22  ;;  %v596_v27 = vpop.f32.mrb[12].mxu1  ;;  %v663_v28 = vpop.eup %662  ;;  %488 = vst.msk [vmem:[%s944_s5 + $0x28] sm:$0xff] %vm482_vm1, %v661_v25 }
  0xf5   :  { %v460_v29 = vadd.f32 %v857_v40, %v415_v24  ;;  %v624_v30 = vpop.f32.mrb[12].mxu0  ;;  %v231_v31 = vpop.f32.mrb[13].mxu1  ;;  %487 = vst.msk [vmem:[%s944_s5 + $0x20] sm:$0xff] %vm482_vm1, %v663_v28 }
  0xf6   :  { %672 = vtanh.f32 %v461_v26  ;;  %v430_v32 = vadd.f32 %v624_v30, %v596_v27  ;;  %v424_v33 = vpop.f32.mrb[13].mxu0 }
  0xf7   :  { %674 = vtanh.f32 %v460_v29  ;;  %v425_v34 = vadd.f32 %v424_v33, %v231_v31  ;;  %v665_v35 = vpop.eup %664 }
  0xf8   :  { %v463_v36 = vadd.f32 %v857_v40, %v430_v32  ;;  %v599_v37 = vpop.f32.mrb[14].mxu1  ;;  %v667_v38 = vpop.eup %666  ;;  %490 = vst.msk [vmem:[%s944_s5 + $0x38] sm:$0xff] %vm482_vm1, %v665_v35 }
  0xf9   :  { %v462_v39 = vadd.f32 %v857_v40, %v425_v34  ;;  %v627_v41 = vpop.f32.mrb[14].mxu0  ;;  %v241_v42 = vpop.f32.mrb[15].mxu1  ;;  %489 = vst.msk [vmem:[%s944_s5 + $0x30] sm:$0xff] %vm482_vm1, %v667_v38 }
  0xfa   :  { %676 = vtanh.f32 %v463_v36  ;;  %v440_v43 = vadd.f32 %v627_v41, %v599_v37  ;;  %v434_v44 = vpop.f32.mrb[15].mxu0 }
  0xfb   :  { %678 = vtanh.f32 %v462_v39  ;;  %v435_v45 = vadd.f32 %v434_v44, %v241_v42 }
  0xfc   :  { %v669_v46 = vpop.eup %668  ;;  %v465_v47 = vadd.f32 %v857_v40, %v440_v43 }
  0xfd   :  { %v671_v48 = vpop.eup %670  ;;  %492 = vst.msk [vmem:[%s944_s5 + $0x48] sm:$0xff] %vm482_vm1, %v669_v46  ;;  %v464_v49 = vadd.f32 %v857_v40, %v435_v45 }
  0xfe   :  { %491 = vst.msk [vmem:[%s944_s5 + $0x40] sm:$0xff] %vm482_vm1, %v671_v48  ;;  %680 = vtanh.f32 %v465_v47 }
  0xff   :  { %682 = vtanh.f32 %v464_v49 }
 0x100   :  { %v673_v50 = vpop.eup %672 }
 0x101   :  { %v675_v51 = vpop.eup %674  ;;  %494 = vst.msk [vmem:[%s944_s5 + $0x58] sm:$0xff] %vm482_vm1, %v673_v50 }
 0x102   :  { %493 = vst.msk [vmem:[%s944_s5 + $0x50] sm:$0xff] %vm482_vm1, %v675_v51 }
 0x104   :  { %v677_v40 = vpop.eup %676 }
 0x105   :  { %v679_v52 = vpop.eup %678  ;;  %496 = vst.msk [vmem:[%s944_s5 + $0x68] sm:$0xff] %vm482_vm1, %v677_v40 }
 0x106   :  { %495 = vst.msk [vmem:[%s944_s5 + $0x60] sm:$0xff] %vm482_vm1, %v679_v52 }
 0x108   :  { %v681_v53 = vpop.eup %680 }
 0x109   :  { %v683_v54 = vpop.eup %682  ;;  %498 = vst.msk [vmem:[%s944_s5 + $0x78] sm:$0xff] %vm482_vm1, %v681_v53 }
 0x10a   :  { %497 = vst.msk [vmem:[%s944_s5 + $0x70] sm:$0xff] %vm482_vm1, %v683_v54 }

</bundles_post_ra>
